<compile_context>
chip_gen: v5e
topology: v5e:2x2
jax: 0.10.0
libtpu: 0.0.40
codegen_flags: <defaults>
</compile_context>

<pallas_src>
import functools
import math

import jax
import jax.numpy as jnp
from jax.experimental import pallas as pl
from jax.experimental.pallas import tpu as pltpu


def _round_up(x: int, m: int) -> int:
    return -(-x // m) * m


def fixed_embedding_table(c_in: int, d_model: int) -> jnp.ndarray:
    """Deterministic FixedEmbedding weight (same formula as the PyTorch __init__)."""
    pos = jnp.arange(c_in, dtype=jnp.float32)[:, None]                    # (c_in, 1)
    div = jnp.exp(
        jnp.arange(0, d_model, 2, dtype=jnp.float32) * (-math.log(10000.0) / d_model)
    )                                                                     # (ceil(d/2),)
    w = jnp.zeros((c_in, d_model), dtype=jnp.float32)
    w = w.at[:, 0::2].set(jnp.sin(pos * div))
    w = w.at[:, 1::2].set(jnp.cos(pos * div[: d_model // 2]))             # odd-d_model safe
    return w


def _broadcast_row_kernel(w_ref, o_ref):
    """c_in == 1 fast path: every valid index is 0 -> broadcast the packed row.

    w_ref: (1, lane_w) f32          table[0] tiled pf times across lanes (zero-padded)
    o_ref: (tile_pack, lane_w)      lane-dense packed output tile
    Pure HBM store at write roofline; no index traffic, no gather VALU work.
    """
    o_ref[...] = jnp.broadcast_to(w_ref[...], o_ref.shape).astype(o_ref.dtype)


def _select_gather_kernel(idx_ref, w_ref, o_ref, *, c_in: int, pf: int, d_pad: int):
    """General small-c_in gather on one packed tile (exact VPU select chain).

    idx_ref: (tile_pack, pf) int32     pf logical indices per packed output row
    w_ref:   (c_in, pf*d_pad) f32      row c = table[c] tiled pf times across lanes
    o_ref:   (tile_pack, pf*d_pad)     lane-dense packed output tile
    """
    idx = idx_ref[...]                                          # (tp, pf)

    # Lane-expand idx once per tile: idxl[r, lane] == idx[r, lane // d_pad].
    # Built with pf-1 compares/selects against a lane iota (no division, no reshape).
    idxl = idx[:, 0:1]
    if pf > 1:
        lane_id = jax.lax.broadcasted_iota(jnp.int32, o_ref.shape, 1)
        for j in range(1, pf):
            idxl = jnp.where(lane_id >= j * d_pad, idx[:, j:j + 1], idxl)

    # Select chain: masks are disjoint (exactly one c matches an in-range index).
    # Out-of-range indices fall through to 0.0 rows (nn.Embedding would raise).
    acc = jnp.where(idxl == 0, w_ref[0:1, :], 0.0)
    for c in range(1, c_in):
        acc = jnp.where(idxl == c, w_ref[c:c + 1, :], acc)
    o_ref[...] = acc.astype(o_ref.dtype)


def temporal_embedding_forward(x_idx: jnp.ndarray, table: jnp.ndarray, *,
                               tile_pack=None, out_dtype=jnp.float32) -> jnp.ndarray:
    """Equivalent of TemporalEmbedding.forward (freq='year'): year_embed(x.long())."""
    orig_shape = x_idx.shape
    c_in, d_model = table.shape
    table = table.astype(jnp.float32)

    # Lane packing: pf logical rows per 128-lane output row, or pad d_model up to a
    # multiple of 128 (pf == 1) so every store is a full, unmasked vst.
    if d_model < 128 and 128 % d_model == 0:
        pf, d_pad = 128 // d_model, d_model
    else:
        pf, d_pad = 1, _round_up(d_model, 128)
    lane_w = pf * d_pad
    table_pad = jnp.pad(table, ((0, 0), (0, d_pad - d_model)))

    n = 1
    for s in orig_shape:
        n *= int(s)
    n_pack = -(-n // pf)

    # Tile sizing: big tiles amortize the ~0.35us per-grid-step overhead, but keep
    # >= 2 grid steps whenever possible so "parallel" can shard across both v7x TCs.
    # Defaults (8192 packed rows for the idx-free year path, 4096 otherwise) keep the
    # double-buffered VMEM footprint well inside v5e's 16 MiB scoped-VMEM default.
    if tile_pack is None:
        tile_pack = 8192 if c_in == 1 else 4096
    tile_pack = min(tile_pack, max(8, _round_up(-(-n_pack // 2), 8)))
    tile_pack = max(8, (tile_pack // 8) * 8)
    n_pack_pad = _round_up(n_pack, tile_pack)
    n_pad = n_pack_pad * pf
    grid = (n_pack_pad // tile_pack,)

    out_itemsize = jnp.dtype(out_dtype).itemsize
    out_shape = jax.ShapeDtypeStruct((n_pack_pad, lane_w), out_dtype)
    out_spec = pl.BlockSpec((tile_pack, lane_w), lambda i: (i, 0))
    cparams = pltpu.CompilerParams(dimension_semantics=("parallel",))

    if c_in == 1:
        # freq='year' case: indices are never read (any in-range index is 0).
        w_row = jnp.tile(table_pad, (1, pf))                            # (1, lane_w)
        out = pl.pallas_call(
            _broadcast_row_kernel,
            out_shape=out_shape,
            grid=grid,
            in_specs=[pl.BlockSpec((1, lane_w), lambda i: (0, 0))],
            out_specs=out_spec,
            compiler_params=cparams,
            cost_estimate=pl.CostEstimate(
                flops=0, transcendentals=0,
                bytes_accessed=int(n_pack_pad * lane_w * out_itemsize + 4 * lane_w)),
        )(w_row)
    else:
        # General path: lane-packed indices + tiled table, select-chain gather.
        flat = x_idx.reshape(-1).astype(jnp.int32)
        flat = jnp.pad(flat, (0, n_pad - n))          # padded tail rows sliced off below
        idx2d = flat.reshape(n_pack_pad, pf)
        w_tiled = jnp.tile(table_pad, (1, pf))                          # (c_in, lane_w)
        flops = n_pack_pad * lane_w * 2 * (c_in + pf)
        bytes_accessed = (n_pack_pad * lane_w * out_itemsize
                          + 4 * n_pack_pad * pf + 4 * c_in * lane_w)
        out = pl.pallas_call(
            functools.partial(_select_gather_kernel, c_in=c_in, pf=pf, d_pad=d_pad),
            out_shape=out_shape,
            grid=grid,
            in_specs=[pl.BlockSpec((tile_pack, pf), lambda i: (i, 0)),
                      pl.BlockSpec((c_in, lane_w), lambda i: (0, 0))],
            out_specs=out_spec,
            compiler_params=cparams,
            cost_estimate=pl.CostEstimate(
                flops=int(flops), transcendentals=0,
                bytes_accessed=int(bytes_accessed)),
        )(idx2d, w_tiled)

    # Unpack lanes back to (..., d_model); row-major packing makes this reshape/slice.
    if pf > 1:
        out = out.reshape(n_pad, d_model)
    else:
        out = out[:, :d_model]
    return out[:n].reshape(*orig_shape, d_model)


if __name__ == "__main__":
    d_model = 32
    year_size = 1  # freq == 'year' -> FixedEmbedding(1, d_model); forward only uses year_embed

    year_table = fixed_embedding_table(year_size, d_model)

    # Small deterministic input: integer "time-feature" tensor (B, L, F).
    key = jax.random.PRNGKey(0)
    x = jax.random.randint(key, shape=(2, 8, 5), minval=0, maxval=year_size,
                           dtype=jnp.int32)

    out = jax.block_until_ready(temporal_embedding_forward(x, year_table))
    ref = jnp.take(year_table, x.reshape(-1), axis=0).reshape(*x.shape, d_model)
    assert out.shape == (2, 8, 5, d_model), out.shape
    assert out.dtype == jnp.float32
    assert jnp.allclose(out, ref), "mismatch vs reference embedding lookup (year path)"

    # Larger shape: exercises multi-step grid, large tiles and tail padding.
    k1, k2 = jax.random.split(key)
    x_big = jax.random.randint(k1, shape=(4, 512, 5), minval=0, maxval=year_size,
                               dtype=jnp.int32)
    out_big = jax.block_until_ready(temporal_embedding_forward(x_big, year_table))
    ref_big = jnp.take(year_table, x_big.reshape(-1), axis=0).reshape(*x_big.shape, d_model)
    assert jnp.allclose(out_big, ref_big), "mismatch on large input"

    # General small-c_in gather path (same module family: month/day/hour tables).
    tbl5 = fixed_embedding_table(5, d_model)
    x5 = jax.random.randint(k2, shape=(3, 7), minval=0, maxval=5, dtype=jnp.int32)
    out5 = jax.block_until_ready(temporal_embedding_forward(x5, tbl5))
    ref5 = jnp.take(tbl5, x5.reshape(-1), axis=0).reshape(*x5.shape, d_model)
    assert jnp.allclose(out5, ref5), "mismatch on multi-row table gather"

    # pf == 1 lane-padded path (d_model not a divisor of 128).
    tbl96 = fixed_embedding_table(1, 96)
    x96 = jax.random.randint(key, shape=(2, 3), minval=0, maxval=1, dtype=jnp.int32)
    out96 = jax.block_until_ready(temporal_embedding_forward(x96, tbl96))
    ref96 = jnp.take(tbl96, x96.reshape(-1), axis=0).reshape(*x96.shape, 96)
    assert jnp.allclose(out96, ref96), "mismatch on lane-padded d_model path"

    print("KERNEL_OK")
</pallas_src>

<mosaic_0001>
module attributes {stable_mosaic.version = 11 : i64} {
  func.func @_broadcast_row_kernel(%arg0: i32, %arg1: memref<1x128xf32, #tpu.memory_space<vmem>>, %arg2: memref<16x128xf32, #tpu.memory_space<vmem>>) attributes {dimension_semantics = [#tpu.dimension_semantics<parallel>], iteration_bounds = array<i64: 2>, scalar_prefetch = 0 : i64, scratch_operands = 0 : i64, tpu.core_type = #tpu.core_type<tc>, window_params = [{pipeline_mode = #tpu.pipeline_mode<synchronous>, transform_indices = @transform_0, window_bounds = array<i64: 1, 128>}, {transform_indices = @transform_1, window_bounds = array<i64: 16, 128>}]} {
    %c0 = arith.constant 0 : index
    %c0_0 = arith.constant 0 : index
    %0 = vector.load %arg1[%c0, %c0_0] : memref<1x128xf32, #tpu.memory_space<vmem>>, vector<1x128xf32>
    %1 = vector.shape_cast %0 : vector<1x128xf32> to vector<1x128xf32>
    %2 = vector.broadcast %1 : vector<1x128xf32> to vector<16x128xf32>
    %c0_1 = arith.constant 0 : index
    %c0_2 = arith.constant 0 : index
    %3 = vector.load %arg2[%c0_1, %c0_2] : memref<16x128xf32, #tpu.memory_space<vmem>>, vector<16x128xf32>
    tpu.vector_store %arg2[%c0_1, %c0_2], %2 {strides = array<i32>} : memref<16x128xf32, #tpu.memory_space<vmem>>, vector<16x128xf32>,
    return
  }
  func.func @transform_0(%arg0: i32) -> (i32, i32) {
    %c0_i32 = arith.constant 0 : i32
    %c0_i32_0 = arith.constant 0 : i32
    %c0_i32_1 = arith.constant 0 : i32
    return %c0_i32, %c0_i32_0 : i32, i32
  }
  func.func @transform_1(%arg0: i32) -> (i32, i32) {
    %c0_i32 = arith.constant 0 : i32
    %c0_i32_0 = arith.constant 0 : i32
    return %arg0, %c0_i32 : i32, i32
  }
}

</mosaic_0001>

<bundles_post_ra>
// kernel: tpu_custom_call.1
= control target key start
LH: loop header
LB: loop body
LE: loop exit
PB: predicated region body
PF: predicated region fallthrough
CT: control target
= control target key end

     0   :  { %6 = vsyncpa [#allocation3], 0  ;;  %s455_s0 = inlined_call_operand.hbm [shape: f32[1,128], index: 0, kind: input, shape index: {}]   ;;  %s456_s1 = inlined_call_operand.hbm [shape: f32[32,128], index: 1, kind: output, shape index: {}]  }
   0x1   :  { %7 = vsyncpa [#allocation4], 0 }
   0x2   :  { %9 = vsyncpa [#allocation4 + $0x1], 0  ;;  %s371_s6 = smov 0   ;;  %s373_s7 = smov 0  }
   0x3   :  { %s375_s8 = smov 0   ;;  %s377_s9 = smov 0  }
   0x4 LB: > { %s392_s10 = sadd.s32 4294967295, %s356_s9   ;;  %s195_s11 = sadd.s32 4294967294, %s356_s9   ;;  %s356_s9 = sphi %s377_s9, %s462_s9   ;;  %s352_s8 = sphi %s375_s8, %s461_s8   ;;  %s348_s7 = sphi %s373_s7, %s460_s7   ;;  %s344_s6 = sphi %s371_s6, %s459_s6  }
   0x5   : > { %s396_s12 = sadd.s32 1, %s356_s9   ;;  %s43_s13 = sadd.s32 1, %s352_s8 }
   0x6   : > { %s40_s14 = ssub.s32 %s356_s9, %s396_s12  ;;  %p53_p0 = scmp.ne.s32.totalorder %s352_s8, %s348_s7 }
   0x7   : > { %p41_p1 = scmp.eq.s32.totalorder %s40_s14, 0  ;;  %p54_p2 = scmp.eq.s32.totalorder %s392_s10, 1 }
   0x8   : > { %p59_p3 = scmp.ne.s32.totalorder %s348_s7, %s344_s6  ;;  %p60_p4 = scmp.eq.s32.totalorder %s195_s11, 1 }
   0x9   : > { %s407_s15 = scalar_select %p41_p1, %s352_s8, %s43_s13  }
   0xa   : > { %p409_p5 = por %p54_p2, %p53_p0  ;;  %p413_p6 = por %p60_p4, %p59_p3 }
   0xb   : > { %p196_p7 = scmp.ge.s32.totalorder %s356_s9, 1  ;;  %p67_p8 = scmp.lt.s32.totalorder %s356_s9, 3 }
   0xc   : > { %p221_p9 = scmp.eq.s32.totalorder %s392_s10, 0  ;;  %s79_s20 = sshll.u32 %s455_s0, 4  ;;  %s80_s20 = int_to_ptr.hbm [resolvable:$true] %s79_s20 }
   0xd   : > { %p68_p10 = pnand %p196_p7, %p67_p8  ;;  %s358_s21 = smov [#allocation2]  }
   0xe   : > { %s81_s22 = sshll.u32 %s358_s21, 4  ;;  %s82_s22 = int_to_ptr.vmem [resolvable:$true] %s81_s22 }
   0xf   : > { %p213_p11 = pneg %p68_p10  ;;  %94 = sbr.rel (%p68_p10) target bundleno = 38 (0x26), region = 24 }
  0x11   : > { %p214_p12 = pnand %p221_p9, %p213_p11 }
  0x13   : > { %216 = dma.hbm_to_vmem [thread:$0]  (!%p214_p12), %s80_s20, 16, %s82_s22, [#allocation3]  }
  0x14   : > { %335 = dma.done.wait (%p221_p9), [#allocation3], 16  }
  0x15   : > { %337 = vsyncadd (%p221_p9), [#allocation3], 4294967280  ;;  %s107_s23 = sand.u32 1, %s348_s7   ;;  %s206_s24 = sshll.u32 %s392_s10, 4  ;;  %v259_v0 = vld [vmem:[#allocation2] ss:$0 sm:$0xff] }
  0x16   : > { %s200_s25 = sshll.u32 %s107_s23, 4  ;;  %s129_s28 = scalar_lea.hbm %s456_s1, %s206_s24 }
  0x17   : > { %s109_s29 = scalar_lea.vmem [#allocation5], %s200_s25  ;;  %s132_s2 = sshll.u32 %s129_s28, 4  ;;  %s133_s2 = int_to_ptr.hbm [resolvable:$true] %s132_s2 }
  0x18   : > { %s130_s30 = sshll.u32 %s109_s29, 4  ;;  %115 = vst [vmem:[%s109_s29] sm:$0xff] %v259_v0  ;;  %s118_s3 = scalar_lea.sflag [#allocation4], %s107_s23  ;;  %s131_s30 = int_to_ptr.vmem [resolvable:$true] %s130_s30 }
  0x19   : > { %116 = vst [vmem:[%s109_s29 + $0x8] sm:$0xff] %v259_v0  ;;  %s304_s4 = sshra.s32 %s133_s2, 4  ;;  %s310_s13 = scalar_lea.hbm %s456_s1, 32  ;;  %s305_s4 = int_to_ptr.hbm [resolvable:$true] %s304_s4 }
  0x1a   : > { %s306_s5 = scalar_lea.hbm %s305_s4, 16  ;;  %p311_p2 = scmp.lt.s32.totalorder %s305_s4, %s456_s1 }
  0x1b   : > { %p307_p13 = scmp.ne.s32.totalorder %s305_s4, %s306_s5  ;;  %p312_p3 = scmp.lt.s32.totalorder %s310_s13, %s306_s5 }
  0x1d   : > { %p308_p0 = pnand %p307_p13, %p409_p5  ;;  %p313_p4 = por %p312_p3, %p311_p2 }
  0x1f   : > { %p309_p1 = pneg %p308_p0 }
  0x21   : > { %p314_p7 = pnand %p313_p4, %p309_p1 }
  0x23   : > { %317 = shalt.err (!%p314_p7)
}
  0x24   : > { %s359_s19 = smov 128   ;;  %s360_s20 = smov 8  }
  0x25   : > { %211 = dma.vmem_to_hbm [thread:$0]  (%p409_p5), %s131_s30, 256, %s133_s2, %s118_s3, %s359_s19, %s359_s19, %s360_s20  }
  0x26 PF: > { %p223_p8 = scmp.ge.s32.totalorder %s356_s9, 2  ;;  %s147_s21 = sand.u32 1, %s344_s6  }
  0x27   : > { %s148_s22 = scalar_lea.sflag [#allocation4], %s147_s21 }
  0x28   : > { %p218_p9 = pnand %p223_p8, %p413_p6 }
  0x2a   : > { %p219_p10 = pneg %p218_p9 }
  0x2c   : > { %339 = dma.done.wait (%p219_p10), %s148_s22, 256  }
  0x2d   : > { %341 = vsyncadd (%p219_p10), %s148_s22, 4294967040  ;;  %p12_p11 = scmp.ge.s32.totalorder %s396_s12, 4   ;;  %s459_s6 = smov %s348_s7 }
  0x2e   : > { %s460_s7 = smov %s352_s8  ;;  %s461_s8 = smov %s407_s15 }
  0x2f   : > { %s462_s9 = smov %s396_s12  ;;  %14 = sbr.rel (!%p12_p11) target bundleno = 4 (0x4), region = 61 }
  0x34   :  { %154 = vsyncpa [#allocation3], 1 }
  0x35   :  { %156 = vsyncpa [#allocation3 + $0x1], 1 }
  0x36   :  { %157 = vsyncpa [#allocation4], 1 }
  0x37   :  { %159 = vsyncpa [#allocation4 + $0x1], 1 }

</bundles_post_ra>
